<compile_context>
chip_gen: v7x
topology: tpu7x:2x2x1
jax: 0.10.0
libtpu: 0.0.40
codegen_flags: <defaults>
</compile_context>

<pallas_src>
import jax
import jax.numpy as jnp
from jax.experimental import pallas as pl
from jax.experimental.pallas import tpu as pltpu


def _round_up(v, m):
    return ((v + m - 1) // m) * m


def mlp_committee_kernel(x_ref, w123_ref, b123_ref, wp3_ref, bp_ref, o_ref):
    # x tile streams in f32; cast to bf16 in-register right before the MXU dot
    # (avoids a separate XLA astype pass over the whole x array in HBM).
    x = x_ref[...].astype(jnp.bfloat16)

    # Fused branch matmul: (tile, F) @ (F, 3H) -> (tile, 3H), f32 accumulation.
    h = jnp.dot(x, w123_ref[...], preferred_element_type=jnp.float32)
    h = jnp.maximum(h + b123_ref[...], 0.0)        # bias + ReLU per branch, f32 VPU

    # Head matmul with the branch-sum folded into the contraction:
    # wp3 = [wp; wp; wp] (3H, C), so relu_cat @ wp3 == (h1 + h2 + h3) @ wp.
    # The 3-way reduce rides the MXU for free (no cross-lane slicing / adds).
    # NOTE: re-casting h to bf16 adds one extra rounding step vs. a pure-f32 path.
    out = jnp.dot(h.astype(wp3_ref.dtype), wp3_ref[...],
                  preferred_element_type=jnp.float32) + bp_ref[...]
    o_ref[...] = out.astype(o_ref.dtype)


def _vmem_estimate(tile, F, H3, C, x_itemsize):
    """Rough VMEM requirement (lane/sublane padded) for the chosen tiling."""
    lane = lambda n: _round_up(n, 128)
    sub = lambda n: _round_up(n, 8)
    x_bytes = 2 * tile * lane(F) * x_itemsize            # double-buffered x tiles
    out_bytes = 2 * tile * lane(C) * 4                    # double-buffered f32 out tiles
    w_bytes = (sub(F) * lane(H3) * 2 + sub(1) * lane(H3) * 4 +       # W123 bf16, b123 f32
               sub(H3) * lane(C) * 2 + sub(1) * lane(C) * 4)         # wp3 bf16, bp f32
    return x_bytes + out_bytes + w_bytes


def _run_pallas(x, p, tile, grid, vmem_limit, *, single_buffer_weights):
    N, F = x.shape
    H3 = p["w123"].shape[1]
    C = p["wp3"].shape[1]

    # Constant-index blocks gain nothing from double-buffering; single-buffer them.
    w_kwargs = ({"pipeline_mode": pl.Buffered(buffer_count=1)}
                if single_buffer_weights else {})

    return pl.pallas_call(
        mlp_committee_kernel,
        out_shape=jax.ShapeDtypeStruct((N, C), x.dtype),
        grid_spec=pl.GridSpec(
            grid=grid,
            in_specs=[
                pl.BlockSpec((tile, F), lambda i: (i, 0)),                  # x tile (f32)
                pl.BlockSpec((F, H3), lambda i: (0, 0), **w_kwargs),        # W123 (bf16)
                pl.BlockSpec((1, H3), lambda i: (0, 0), **w_kwargs),        # b123 (f32)
                pl.BlockSpec((H3, C), lambda i: (0, 0), **w_kwargs),        # wp3 (bf16)
                pl.BlockSpec((1, C), lambda i: (0, 0), **w_kwargs),         # bp (f32)
            ],
            out_specs=pl.BlockSpec((tile, C), lambda i: (i, 0)),
        ),
        compiler_params=pltpu.CompilerParams(
            dimension_semantics=("parallel",),
            vmem_limit_bytes=vmem_limit,
        ),
    )(x, p["w123"], p["b123"], p["wp3"], p["bp"])


def mlp_committee_forward(x, params, *, tile_n=512):
    """x: (N, in_features) float32.  params from init_params()[0]."""
    N, F = x.shape
    H3 = params["w123"].shape[1]
    C = params["wp3"].shape[1]

    # Batch tile: multiple of 16 (bf16 packs 16 rows per vreg sublane group),
    # clamped for tiny batches.  No padding of x is needed: grid = cdiv(N, tile),
    # the tail block reads OOB rows (undefined) and its OOB output rows are
    # discarded on store -- rows are fully independent, so this is safe.
    tile = min(_round_up(max(tile_n, 16), 16), _round_up(N, 16))
    # Keep >= 2 grid steps when the batch allows so both v7x TensorCores get work.
    if pl.cdiv(N, tile) < 2 and N > 16:
        tile = _round_up(pl.cdiv(N, 2), 16)
    grid = (pl.cdiv(N, tile),)

    # VMEM budget derived from actual buffer sizes; floor 16 MiB, cap 64 MiB (v7x).
    est = _vmem_estimate(tile, F, H3, C, x.dtype.itemsize)
    vmem_limit = int(min(64 * 2**20, max(16 * 2**20, 2 * est)))

    try:
        return _run_pallas(x, params, tile, grid, vmem_limit,
                           single_buffer_weights=True)
    except Exception:
        # Fallback if this jax build rejects pl.Buffered(buffer_count=1) on
        # constant-index blocks; identical semantics, default double-buffering.
        return _run_pallas(x, params, tile, grid, vmem_limit,
                           single_buffer_weights=False)


def init_params(key, in_features, hidden_size, num_classes):
    """Deterministic init mimicking torch.nn.Linear.reset_parameters (uniform bounds).

    Returns (kernel_params, ref_params):
      kernel_params: fused/transposed weights for the Pallas kernel
        w123 (F, 3H) bf16, b123 (1, 3H) f32, wp3 (3H, C) bf16 (= [wp; wp; wp]),
        bp (1, C) f32.
      ref_params: the original per-branch f32 weights for the pure-JAX reference.
    """
    ks = jax.random.split(key, 8)

    def linear(kw, kb, fan_in, fan_out):
        bound = 1.0 / jnp.sqrt(fan_in)
        # Stored transposed: (fan_in, fan_out) so the kernel does x @ W.
        w = jax.random.uniform(kw, (fan_in, fan_out), jnp.float32, -bound, bound)
        b = jax.random.uniform(kb, (1, fan_out), jnp.float32, -bound, bound)
        return w, b

    w1, b1 = linear(ks[0], ks[1], in_features, hidden_size)
    w2, b2 = linear(ks[2], ks[3], in_features, hidden_size)
    w3, b3 = linear(ks[4], ks[5], in_features, hidden_size)
    wp, bp = linear(ks[6], ks[7], hidden_size, num_classes)

    w123 = jnp.concatenate([w1, w2, w3], axis=1)    # (F, 3H)
    b123 = jnp.concatenate([b1, b2, b3], axis=1)    # (1, 3H)
    wp3 = jnp.concatenate([wp, wp, wp], axis=0)     # (3H, C): branch-sum folded into K

    kernel_params = dict(
        w123=w123.astype(jnp.bfloat16),
        b123=b123,
        wp3=wp3.astype(jnp.bfloat16),
        bp=bp,
    )
    ref_params = dict(w1=w1, b1=b1, w2=w2, b2=b2, w3=w3, b3=b3, wp=wp, bp=bp)
    return kernel_params, ref_params


def reference_forward(x, r):
    """Pure-f32 reference matching MLPCommittee.forward (eval mode: Dropout = identity)."""
    h1 = jnp.maximum(x @ r["w1"] + r["b1"], 0.0)
    h2 = jnp.maximum(x @ r["w2"] + r["b2"], 0.0)
    h3 = jnp.maximum(x @ r["w3"] + r["b3"], 0.0)
    return (h1 + h2 + h3) @ r["wp"] + r["bp"]


if __name__ == "__main__":
    in_features, hidden_size, num_classes = 32, 16, 4
    N = 200  # not a multiple of the tile -> exercises the partial tail block path

    key = jax.random.PRNGKey(0)
    kx, kp = jax.random.split(key)
    x = jax.random.normal(kx, (N, in_features), jnp.float32)
    kernel_params, ref_params = init_params(kp, in_features, hidden_size, num_classes)

    out = mlp_committee_forward(x, kernel_params)   # tile clamped / split for small N
    out = jax.block_until_ready(out)

    ref = reference_forward(x, ref_params)
    assert out.shape == (N, num_classes)
    # bf16 streams with f32 accumulation vs. the pure-f32 reference.
    assert jnp.allclose(out, ref, atol=5e-2, rtol=5e-2), "mismatch vs reference"

    print("KERNEL_OK")
</pallas_src>

<mosaic_0001>
module attributes {stable_mosaic.version = 11 : i64} {
  func.func @mlp_committee_kernel(%arg0: i32, %arg1: memref<112x32xf32, #tpu.memory_space<vmem>>, %arg2: memref<32x48xbf16, #tpu.memory_space<vmem>>, %arg3: memref<1x48xf32, #tpu.memory_space<vmem>>, %arg4: memref<48x4xbf16, #tpu.memory_space<vmem>>, %arg5: memref<1x4xf32, #tpu.memory_space<vmem>>, %arg6: memref<112x4xf32, #tpu.memory_space<vmem>>) attributes {dimension_semantics = [#tpu.dimension_semantics<parallel>], iteration_bounds = array<i64: 2>, scalar_prefetch = 0 : i64, scratch_operands = 0 : i64, tpu.core_type = #tpu.core_type<tc>, window_params = [{transform_indices = @transform_0, window_bounds = array<i64: 112, 32>}, {pipeline_mode = #tpu.pipeline_mode<synchronous>, transform_indices = @transform_1, window_bounds = array<i64: 32, 48>}, {pipeline_mode = #tpu.pipeline_mode<synchronous>, transform_indices = @transform_2, window_bounds = array<i64: 1, 48>}, {pipeline_mode = #tpu.pipeline_mode<synchronous>, transform_indices = @transform_3, window_bounds = array<i64: 48, 4>}, {pipeline_mode = #tpu.pipeline_mode<synchronous>, transform_indices = @transform_4, window_bounds = array<i64: 1, 4>}, {transform_indices = @transform_5, window_bounds = array<i64: 112, 4>}]} {
    %c0 = arith.constant 0 : index
    %c0_0 = arith.constant 0 : index
    %0 = vector.load %arg1[%c0, %c0_0] : memref<112x32xf32, #tpu.memory_space<vmem>>, vector<112x32xf32>
    %1 = arith.truncf %0 : vector<112x32xf32> to vector<112x32xbf16>
    %c0_1 = arith.constant 0 : index
    %c0_2 = arith.constant 0 : index
    %2 = vector.load %arg2[%c0_1, %c0_2] : memref<32x48xbf16, #tpu.memory_space<vmem>>, vector<32x48xbf16>
    %cst = arith.constant dense<0.000000e+00> : vector<112x48xf32>
    %3 = tpu.matmul %1, %2, %cst {dimension_numbers = #tpu.dot_dimension_numbers<[1], [0], [0], [1], [0, 0, 1, 1], [], []>} : vector<112x32xbf16>, vector<32x48xbf16>, vector<112x48xf32> -> vector<112x48xf32>
    %c0_3 = arith.constant 0 : index
    %c0_4 = arith.constant 0 : index
    %4 = vector.load %arg3[%c0_3, %c0_4] : memref<1x48xf32, #tpu.memory_space<vmem>>, vector<1x48xf32>
    %5 = vector.broadcast %4 : vector<1x48xf32> to vector<112x48xf32>
    %6 = arith.addf %3, %5 : vector<112x48xf32>
    %cst_5 = arith.constant 0.000000e+00 : f32
    %7 = vector.broadcast %cst_5 : f32 to vector<112x48xf32>
    %8 = arith.maximumf %6, %7 : vector<112x48xf32>
    %9 = arith.truncf %8 : vector<112x48xf32> to vector<112x48xbf16>
    %c0_6 = arith.constant 0 : index
    %c0_7 = arith.constant 0 : index
    %10 = vector.load %arg4[%c0_6, %c0_7] : memref<48x4xbf16, #tpu.memory_space<vmem>>, vector<48x4xbf16>
    %cst_8 = arith.constant dense<0.000000e+00> : vector<112x4xf32>
    %11 = tpu.matmul %9, %10, %cst_8 {dimension_numbers = #tpu.dot_dimension_numbers<[1], [0], [0], [1], [0, 0, 1, 1], [], []>} : vector<112x48xbf16>, vector<48x4xbf16>, vector<112x4xf32> -> vector<112x4xf32>
    %c0_9 = arith.constant 0 : index
    %c0_10 = arith.constant 0 : index
    %12 = vector.load %arg5[%c0_9, %c0_10] : memref<1x4xf32, #tpu.memory_space<vmem>>, vector<1x4xf32>
    %13 = vector.broadcast %12 : vector<1x4xf32> to vector<112x4xf32>
    %14 = arith.addf %11, %13 : vector<112x4xf32>
    %c0_11 = arith.constant 0 : index
    %c0_12 = arith.constant 0 : index
    %15 = vector.load %arg6[%c0_11, %c0_12] : memref<112x4xf32, #tpu.memory_space<vmem>>, vector<112x4xf32>
    tpu.vector_store %arg6[%c0_11, %c0_12], %14 {strides = array<i32>} : memref<112x4xf32, #tpu.memory_space<vmem>>, vector<112x4xf32>,
    return
  }
  func.func @transform_0(%arg0: i32) -> (i32, i32) {
    %c0_i32 = arith.constant 0 : i32
    %c0_i32_0 = arith.constant 0 : i32
    return %arg0, %c0_i32 : i32, i32
  }
  func.func @transform_1(%arg0: i32) -> (i32, i32) {
    %c0_i32 = arith.constant 0 : i32
    %c0_i32_0 = arith.constant 0 : i32
    %c0_i32_1 = arith.constant 0 : i32
    return %c0_i32, %c0_i32_0 : i32, i32
  }
  func.func @transform_2(%arg0: i32) -> (i32, i32) {
    %c0_i32 = arith.constant 0 : i32
    %c0_i32_0 = arith.constant 0 : i32
    %c0_i32_1 = arith.constant 0 : i32
    return %c0_i32, %c0_i32_0 : i32, i32
  }
  func.func @transform_3(%arg0: i32) -> (i32, i32) {
    %c0_i32 = arith.constant 0 : i32
    %c0_i32_0 = arith.constant 0 : i32
    %c0_i32_1 = arith.constant 0 : i32
    return %c0_i32, %c0_i32_0 : i32, i32
  }
  func.func @transform_4(%arg0: i32) -> (i32, i32) {
    %c0_i32 = arith.constant 0 : i32
    %c0_i32_0 = arith.constant 0 : i32
    %c0_i32_1 = arith.constant 0 : i32
    return %c0_i32, %c0_i32_0 : i32, i32
  }
  func.func @transform_5(%arg0: i32) -> (i32, i32) {
    %c0_i32 = arith.constant 0 : i32
    %c0_i32_0 = arith.constant 0 : i32
    return %arg0, %c0_i32 : i32, i32
  }
}

module attributes {stable_mosaic.version = 11 : i64} {
  func.func @mlp_committee_kernel(%arg0: i32, %arg1: memref<112x32xf32, #tpu.memory_space<vmem>>, %arg2: memref<32x48xbf16, #tpu.memory_space<vmem>>, %arg3: memref<1x48xf32, #tpu.memory_space<vmem>>, %arg4: memref<48x4xbf16, #tpu.memory_space<vmem>>, %arg5: memref<1x4xf32, #tpu.memory_space<vmem>>, %arg6: memref<112x4xf32, #tpu.memory_space<vmem>>) attributes {dimension_semantics = [#tpu.dimension_semantics<parallel>], iteration_bounds = array<i64: 2>, scalar_prefetch = 0 : i64, scratch_operands = 0 : i64, tpu.core_type = #tpu.core_type<tc>, window_params = [{transform_indices = @transform_0, window_bounds = array<i64: 112, 32>}, {pipeline_mode = #tpu.pipeline_mode<synchronous>, transform_indices = @transform_1, window_bounds = array<i64: 32, 48>}, {pipeline_mode = #tpu.pipeline_mode<synchronous>, transform_indices = @transform_2, window_bounds = array<i64: 1, 48>}, {pipeline_mode = #tpu.pipeline_mode<synchronous>, transform_indices = @transform_3, window_bounds = array<i64: 48, 4>}, {pipeline_mode = #tpu.pipeline_mode<synchronous>, transform_indices = @transform_4, window_bounds = array<i64: 1, 4>}, {transform_indices = @transform_5, window_bounds = array<i64: 112, 4>}]} {
    %c0 = arith.constant 0 : index
    %c0_0 = arith.constant 0 : index
    %0 = vector.load %arg1[%c0, %c0_0] : memref<112x32xf32, #tpu.memory_space<vmem>>, vector<112x32xf32>
    %1 = arith.truncf %0 : vector<112x32xf32> to vector<112x32xbf16>
    %c0_1 = arith.constant 0 : index
    %c0_2 = arith.constant 0 : index
    %2 = vector.load %arg2[%c0_1, %c0_2] : memref<32x48xbf16, #tpu.memory_space<vmem>>, vector<32x48xbf16>
    %cst = arith.constant dense<0.000000e+00> : vector<112x48xf32>
    %3 = tpu.matmul %1, %2, %cst {dimension_numbers = #tpu.dot_dimension_numbers<[1], [0], [0], [1], [0, 0, 1, 1], [], []>} : vector<112x32xbf16>, vector<32x48xbf16>, vector<112x48xf32> -> vector<112x48xf32>
    %c0_3 = arith.constant 0 : index
    %c0_4 = arith.constant 0 : index
    %4 = vector.load %arg3[%c0_3, %c0_4] : memref<1x48xf32, #tpu.memory_space<vmem>>, vector<1x48xf32>
    %5 = vector.broadcast %4 : vector<1x48xf32> to vector<112x48xf32>
    %6 = arith.addf %3, %5 : vector<112x48xf32>
    %cst_5 = arith.constant 0.000000e+00 : f32
    %7 = vector.broadcast %cst_5 : f32 to vector<112x48xf32>
    %8 = arith.maximumf %6, %7 : vector<112x48xf32>
    %9 = arith.truncf %8 : vector<112x48xf32> to vector<112x48xbf16>
    %c0_6 = arith.constant 0 : index
    %c0_7 = arith.constant 0 : index
    %10 = vector.load %arg4[%c0_6, %c0_7] : memref<48x4xbf16, #tpu.memory_space<vmem>>, vector<48x4xbf16>
    %cst_8 = arith.constant dense<0.000000e+00> : vector<112x4xf32>
    %11 = tpu.matmul %9, %10, %cst_8 {dimension_numbers = #tpu.dot_dimension_numbers<[1], [0], [0], [1], [0, 0, 1, 1], [], []>} : vector<112x48xbf16>, vector<48x4xbf16>, vector<112x4xf32> -> vector<112x4xf32>
    %c0_9 = arith.constant 0 : index
    %c0_10 = arith.constant 0 : index
    %12 = vector.load %arg5[%c0_9, %c0_10] : memref<1x4xf32, #tpu.memory_space<vmem>>, vector<1x4xf32>
    %13 = vector.broadcast %12 : vector<1x4xf32> to vector<112x4xf32>
    %14 = arith.addf %11, %13 : vector<112x4xf32>
    %c0_11 = arith.constant 0 : index
    %c0_12 = arith.constant 0 : index
    %15 = vector.load %arg6[%c0_11, %c0_12] : memref<112x4xf32, #tpu.memory_space<vmem>>, vector<112x4xf32>
    tpu.vector_store %arg6[%c0_11, %c0_12], %14 {strides = array<i32>} : memref<112x4xf32, #tpu.memory_space<vmem>>, vector<112x4xf32>,
    return
  }
  func.func @transform_0(%arg0: i32) -> (i32, i32) {
    %c0_i32 = arith.constant 0 : i32
    %c0_i32_0 = arith.constant 0 : i32
    return %arg0, %c0_i32 : i32, i32
  }
  func.func @transform_1(%arg0: i32) -> (i32, i32) {
    %c0_i32 = arith.constant 0 : i32
    %c0_i32_0 = arith.constant 0 : i32
    %c0_i32_1 = arith.constant 0 : i32
    return %c0_i32, %c0_i32_0 : i32, i32
  }
  func.func @transform_2(%arg0: i32) -> (i32, i32) {
    %c0_i32 = arith.constant 0 : i32
    %c0_i32_0 = arith.constant 0 : i32
    %c0_i32_1 = arith.constant 0 : i32
    return %c0_i32, %c0_i32_0 : i32, i32
  }
  func.func @transform_3(%arg0: i32) -> (i32, i32) {
    %c0_i32 = arith.constant 0 : i32
    %c0_i32_0 = arith.constant 0 : i32
    %c0_i32_1 = arith.constant 0 : i32
    return %c0_i32, %c0_i32_0 : i32, i32
  }
  func.func @transform_4(%arg0: i32) -> (i32, i32) {
    %c0_i32 = arith.constant 0 : i32
    %c0_i32_0 = arith.constant 0 : i32
    %c0_i32_1 = arith.constant 0 : i32
    return %c0_i32, %c0_i32_0 : i32, i32
  }
  func.func @transform_5(%arg0: i32) -> (i32, i32) {
    %c0_i32 = arith.constant 0 : i32
    %c0_i32_0 = arith.constant 0 : i32
    return %arg0, %c0_i32 : i32, i32
  }
}

</mosaic_0001>

<bundles_post_ra>
// kernel: tpu_custom_call.1
= control target key start
LH: loop header
LB: loop body
LE: loop exit
PB: predicated region body
PF: predicated region fallthrough
CT: control target
= control target key end

     0   :  { %s1194_s18 = smov 0   ;;  %s1196_s19 = smov 0   ;;  %s1453_s0 = inlined_call_operand.vmem [shape: f32[200,32], index: 0, kind: input, shape index: {}]   ;;  %s1454_s1 = inlined_call_operand.vmem [shape: bf16[32,48], index: 1, kind: input, shape index: {}]   ;;  %s1455_s2 = inlined_call_operand.vmem [shape: f32[1,48], index: 2, kind: input, shape index: {}]   ;;  %s1456_s3 = inlined_call_operand.vmem [shape: bf16[48,4], index: 3, kind: input, shape index: {}]   ;;  %s1457_s4 = inlined_call_operand.vmem [shape: f32[1,4], index: 4, kind: input, shape index: {}]   ;;  %s1458_s5 = inlined_call_operand.vmem [shape: f32[200,4], index: 5, kind: output, shape index: {}]  }
   0x1   :  { %s1198_s20 = smov 0  }
   0x2 LB: > { %s1207_s21 = sadd.s32 4294967295, %s1128_s20   ;;  %s1209_s22 = sadd.s32 1, %s1128_s20   ;;  %s1128_s20 = sphi %s1198_s20, %s1465_s20   ;;  %s1124_s19 = sphi %s1196_s19, %s1464_s19   ;;  %s1120_s18 = sphi %s1194_s18, %s1463_s18  }
   0x3   : > { %s129_s23 = ssub.s32 %s1128_s20, %s1209_s22  ;;  %s132_s24 = sadd.s32 1, %s1124_s19 }
   0x4   : > { %p130_p0 = scmp.eq.s32.totalorder %s129_s23, 0  ;;  %p142_p1 = scmp.ne.s32.totalorder %s1124_s19, %s1120_s18 }
   0x5   : > { %p143_p2 = scmp.eq.s32.totalorder %s1207_s21, 1  ;;  %p852_p3 = scmp.ge.s32.totalorder %s1128_s20, 1 }
   0x6   : > { %s1217_s25 = scalar_select %p130_p0, %s1124_s19, %s132_s24  }
   0x7   : > { %p1219_p4 = por %p143_p2, %p142_p1  ;;  %p196_p5 = scmp.lt.s32.totalorder %s1128_s20, 3 }
   0x9   : > { %p197_p6 = pnand %p852_p3, %p196_p5 }
   0xa   : > { %v1065_v0 = vld [vmem:[%s1454_s1] sm:$0xff] (!%p197_p6)   ;;  %v1162_v1 = vmov (!%p197_p6), 0.0   ;;  %v1066_v2 = vld [vmem:[%s1454_s1 + $0x8] sm:$0xff] (!%p197_p6)   ;;  %vm1163_vm0 = vmmov (!%p197_p6), 0   ;;  %s1234_s6 = smul.u32 (!%p197_p6), 14, %s1207_s21  ;;  %vm291_vm1 = vcmask (!%p197_p6), 261120  }
   0xb   : > { %200 = sbr.rel (%p197_p6) target bundleno = 571 (0x23b), region = 40  ;;  %907 = vmatprep.subr.bf16.mxu0 (!%p197_p6), %v1162_v1  ;;  %939 = vmatprep.subr.bf16.mxu1 (!%p197_p6), %v1162_v1  ;;  %v1067_v3 = vld [vmem:[%s1456_s3] sm:$0xff] (!%p197_p6)   ;;  %v1068_v25 = vld [vmem:[%s1456_s3 + $0x8] sm:$0xff] (!%p197_p6)   ;;  %v1069_v26 = vld [vmem:[%s1456_s3 + $0x10] sm:$0xff] (!%p197_p6)   ;;  %vm454_vm2 = vcmask (!%p197_p6), 392192   ;;  %s224_s24 = sand.u32 (!%p197_p6), 1, %s1120_s18  }
   0xc   : > { %908 = vmatpush3.bf16.msra.mxu0 (!%p197_p6), %v1065_v0  ;;  %911 = vmatprep.mubr.msk.bf16.mxu0 (!%p197_p6), %vm1163_vm0, %v1162_v1  ;;  %p232_p7 = scmp.lt.s32.totalorder (!%p197_p6), %s1234_s6, 24  ;;  %v1293_v27 = vld [vmem:[%s1455_s2] ss:$0 sm:$0xff] (!%p197_p6)  ;;  %s973_s27 = smul.u32 (!%p197_p6), 112, %s224_s24  ;;  %vm565_vm3 = vcmask (!%p197_p6), 31744  }
   0xd   : > { %909 = vmatprep.subr.bf16.mxu0 (!%p197_p6), %v1162_v1  ;;  %945 = vmatprep.mubr.msk.bf16.mxu1 (!%p197_p6), %vm1163_vm0, %v1162_v1 }
   0xe   : > { %940 = vmatpush3.bf16.msra.mxu1 (!%p197_p6), %v1067_v3  ;;  %s1332_s30 = scalar_lea.vmem (!%p197_p6), [#allocation2], %s973_s27  }
   0xf   : > { %941 = vmatprep.subr.bf16.mxu1 (!%p197_p6), %v1162_v1 }
  0x10   : > { %910 = vmatpush3.bf16.msra.mxu0 (!%p197_p6), %v1066_v2 }
  0x12   : > { %s233_s9 = scalar_select %p232_p7, %s1234_s6, 24  ;;  %942 = vmatpush3.bf16.msra.mxu1 %v1068_v25 }
  0x13   : > { %943 = vmatprep.subr.bf16.mxu1 %v1162_v1  ;;  %s588_s18 = ssub.s32 (%p1219_p4), 25, %s1234_s6  ;;  %s887_s7 = smul.u32 (%p1219_p4), 112, %s1207_s21 }
  0x14   : > { %s853_s10 = sshll.u32 %s233_s9, 3  ;;  %p589_p8 = scmp.lt.s32.totalorder (%p1219_p4), %s588_s18, 14 }
  0x15   : > { %s1248_s13 = scalar_lea.vmem %s1453_s0, %s853_s10  ;;  %s1369_s10 = scalar_lea.vmem (%p1219_p4), %s1458_s5, %s887_s7  }
  0x16   : > { %v247_v4 = vld [vmem:[%s1248_s13] sm:$0xff]  ;;  %v248_v5 = vld [vmem:[%s1248_s13 + $0x8] sm:$0xff]  ;;  %v249_v7 = vld [vmem:[%s1248_s13 + $0x10] sm:$0xff]  ;;  %944 = vmatpush3.bf16.msra.mxu1 %v1069_v26 }
  0x17   : > { %v261_v6 = vpack.c.bf16 %v248_v5, %v247_v4  ;;  %v250_v8 = vld [vmem:[%s1248_s13 + $0x18] sm:$0xff]  ;;  %v251_v10 = vld [vmem:[%s1248_s13 + $0x20] sm:$0xff]  ;;  %v252_v11 = vld [vmem:[%s1248_s13 + $0x28] sm:$0xff] }
  0x18   : > { %v262_v9 = vpack.c.bf16 %v250_v8, %v249_v7  ;;  %v263_v12 = vpack.c.bf16 %v252_v11, %v251_v10  ;;  %v253_v13 = vld [vmem:[%s1248_s13 + $0x30] sm:$0xff]  ;;  %v254_v14 = vld [vmem:[%s1248_s13 + $0x38] sm:$0xff]  ;;  %v255_v16 = vld [vmem:[%s1248_s13 + $0x40] sm:$0xff] }
  0x19   : > { %912 = vmatmul.mubr.msk.bf16.vlgmr.msra.gmra.mrb[0].mxu0 %vm291_vm1, %v261_v6  ;;  %v264_v15 = vpack.c.bf16 %v254_v14, %v253_v13  ;;  %v256_v17 = vld [vmem:[%s1248_s13 + $0x48] sm:$0xff]  ;;  %v257_v19 = vld [vmem:[%s1248_s13 + $0x50] sm:$0xff]  ;;  %v258_v20 = vld [vmem:[%s1248_s13 + $0x58] sm:$0xff] }
  0x1a   : > { %915 = vmatprep.mubr.msk.bf16.mxu0 %vm1163_vm0, %v1162_v1  ;;  %v265_v18 = vpack.c.bf16 %v256_v17, %v255_v16  ;;  %v266_v21 = vpack.c.bf16 %v258_v20, %v257_v19  ;;  %v259_v22 = vld [vmem:[%s1248_s13 + $0x60] sm:$0xff]  ;;  %v260_v23 = vld [vmem:[%s1248_s13 + $0x68] sm:$0xff] }
  0x1b   : > { %v267_v24 = vpack.c.bf16 %v260_v23, %v259_v22 }
  0x21   : > { %916 = vmatmul.mubr.msk.bf16.gmra.mrb[4].mxu0 %vm291_vm1, %v262_v9 }
  0x22   : > { %919 = vmatprep.mubr.msk.bf16.mxu0 %vm1163_vm0, %v1162_v1 }
  0x29   : > { %920 = vmatmul.mubr.msk.bf16.gmra.mrb[8].mxu0 %vm291_vm1, %v263_v12 }
  0x2a   : > { %923 = vmatprep.mubr.msk.bf16.mxu0 %vm1163_vm0, %v1162_v1 }
  0x31   : > { %924 = vmatmul.mubr.msk.bf16.gmra.mrb[12].mxu0 %vm291_vm1, %v264_v15 }
  0x32   : > { %927 = vmatprep.mubr.msk.bf16.mxu0 %vm1163_vm0, %v1162_v1 }
  0x39   : > { %928 = vmatmul.mubr.msk.bf16.gmra.mrb[16].mxu0 %vm291_vm1, %v265_v18 }
  0x3a   : > { %931 = vmatprep.mubr.msk.bf16.mxu0 %vm1163_vm0, %v1162_v1 }
  0x41   : > { %932 = vmatmul.mubr.msk.bf16.gmra.mrb[20].mxu0 %vm291_vm1, %v266_v21 }
  0x42   : > { %935 = vmatprep.mubr.msk.bf16.mxu0 %vm1163_vm0, %v1162_v1 }
  0x49   : > { %936 = vmatmul.mubr.msk.bf16.gmra.mrb[24].mxu0 %vm291_vm1, %v267_v24 }
  0xec   : > { %v347_v28 = vpop.f32.mrb[0].mxu0 }
  0xed   : > { %v348_v29 = vadd.f32 %v1293_v27, %v347_v28  ;;  %v913_v30 = vpop.f32.mrb[1].mxu0 }
  0xee   : > { %v350_v31 = vpop.f32.mrb[2].mxu0 }
  0xef   : > { %v351_v32 = vadd.f32 %v1293_v27, %v350_v31  ;;  %v914_v33 = vpop.f32.mrb[3].mxu0  ;;  %v402_v34 = vmax.f32 %v348_v29, 0.0  ;;  %v864_v29 = vld [vmem:[%s1457_s4] ss:$0 sm:$0xff] }
  0xf1   : > { %v403_v35 = vmax.f32 %v351_v32, 0.0 }
  0xf3   : > { %v416_v36 = vpack.c.bf16 %v403_v35, %v402_v34 }
  0xf4   : > { %v355_v37 = vpop.f32.mrb[4].mxu0 }
  0xf5   : > { %v356_v38 = vadd.f32 %v1293_v27, %v355_v37  ;;  %v917_v39 = vpop.f32.mrb[5].mxu0  ;;  %946 = vmatmul.mubr.msk.bf16.vlgmr.msra.gmra.mrb[0].mxu1 %vm454_vm2, %v416_v36 }
  0xf6   : > { %v358_v40 = vpop.f32.mrb[6].mxu0  ;;  %949 = vmatprep.mubr.msk.bf16.mxu1 %vm1163_vm0, %v1162_v1 }
  0xf7   : > { %v359_v41 = vadd.f32 %v1293_v27, %v358_v40  ;;  %v918_v42 = vpop.f32.mrb[7].mxu0  ;;  %v404_v43 = vmax.f32 %v356_v38, 0.0 }
  0xf9   : > { %v405_v44 = vmax.f32 %v359_v41, 0.0 }
  0xfb   : > { %v417_v45 = vpack.c.bf16 %v405_v44, %v404_v43 }
  0xfc   : > { %v363_v46 = vpop.f32.mrb[8].mxu0 }
  0xfd   : > { %v364_v47 = vadd.f32 %v1293_v27, %v363_v46  ;;  %v921_v48 = vpop.f32.mrb[9].mxu0  ;;  %950 = vmatmul.mubr.msk.bf16.gmra.mrb[4].mxu1 %vm454_vm2, %v417_v45 }
  0xfe   : > { %v366_v49 = vpop.f32.mrb[10].mxu0  ;;  %953 = vmatprep.mubr.msk.bf16.mxu1 %vm1163_vm0, %v1162_v1 }
  0xff   : > { %v367_v50 = vadd.f32 %v1293_v27, %v366_v49  ;;  %v922_v51 = vpop.f32.mrb[11].mxu0  ;;  %v406_v52 = vmax.f32 %v364_v47, 0.0 }
 0x101   : > { %v407_v53 = vmax.f32 %v367_v50, 0.0 }
 0x103   : > { %v418_v54 = vpack.c.bf16 %v407_v53, %v406_v52 }
 0x104   : > { %v371_v55 = vpop.f32.mrb[12].mxu0 }
 0x105   : > { %v372_v56 = vadd.f32 %v1293_v27, %v371_v55  ;;  %v925_v57 = vpop.f32.mrb[13].mxu0  ;;  %954 = vmatmul.mubr.msk.bf16.gmra.mrb[8].mxu1 %vm454_vm2, %v418_v54 }
 0x106   : > { %v374_v58 = vpop.f32.mrb[14].mxu0  ;;  %957 = vmatprep.mubr.msk.bf16.mxu1 %vm1163_vm0, %v1162_v1 }
 0x107   : > { %v375_v59 = vadd.f32 %v1293_v27, %v374_v58  ;;  %v926_v60 = vpop.f32.mrb[15].mxu0  ;;  %v408_v61 = vmax.f32 %v372_v56, 0.0 }
 0x109   : > { %v409_v62 = vmax.f32 %v375_v59, 0.0 }
 0x10b   : > { %v419_v63 = vpack.c.bf16 %v409_v62, %v408_v61 }
 0x10c   : > { %v379_v0 = vpop.f32.mrb[16].mxu0 }
 0x10d   : > { %v380_v2 = vadd.f32 %v1293_v27, %v379_v0  ;;  %v929_v3 = vpop.f32.mrb[17].mxu0  ;;  %958 = vmatmul.mubr.msk.bf16.gmra.mrb[12].mxu1 %vm454_vm2, %v419_v63 }
 0x10e   : > { %v382_v4 = vpop.f32.mrb[18].mxu0  ;;  %961 = vmatprep.mubr.msk.bf16.mxu1 %vm1163_vm0, %v1162_v1 }
 0x10f   : > { %v383_v5 = vadd.f32 %v1293_v27, %v382_v4  ;;  %v930_v6 = vpop.f32.mrb[19].mxu0  ;;  %v410_v7 = vmax.f32 %v380_v2, 0.0 }
 0x111   : > { %v411_v8 = vmax.f32 %v383_v5, 0.0 }
 0x113   : > { %v420_v9 = vpack.c.bf16 %v411_v8, %v410_v7 }
 0x114   : > { %v387_v10 = vpop.f32.mrb[20].mxu0 }
 0x115   : > { %v388_v11 = vadd.f32 %v1293_v27, %v387_v10  ;;  %v933_v12 = vpop.f32.mrb[21].mxu0  ;;  %962 = vmatmul.mubr.msk.bf16.gmra.mrb[16].mxu1 %vm454_vm2, %v420_v9 }
 0x116   : > { %v390_v13 = vpop.f32.mrb[22].mxu0  ;;  %965 = vmatprep.mubr.msk.bf16.mxu1 %vm1163_vm0, %v1162_v1 }
 0x117   : > { %v391_v14 = vadd.f32 %v1293_v27, %v390_v13  ;;  %v934_v15 = vpop.f32.mrb[23].mxu0  ;;  %v412_v16 = vmax.f32 %v388_v11, 0.0 }
 0x119   : > { %v413_v17 = vmax.f32 %v391_v14, 0.0 }
 0x11b   : > { %v421_v18 = vpack.c.bf16 %v413_v17, %v412_v16 }
 0x11c   : > { %v395_v19 = vpop.f32.mrb[24].mxu0 }
 0x11d   : > { %v396_v20 = vadd.f32 %v1293_v27, %v395_v19  ;;  %v937_v21 = vpop.f32.mrb[25].mxu0  ;;  %966 = vmatmul.mubr.msk.bf16.gmra.mrb[20].mxu1 %vm454_vm2, %v421_v18 }
 0x11e   : > { %v398_v22 = vpop.f32.mrb[26].mxu0  ;;  %969 = vmatprep.mubr.msk.bf16.mxu1 %vm1163_vm0, %v1162_v1 }
 0x11f   : > { %v399_v23 = vadd.f32 %v1293_v27, %v398_v22  ;;  %v938_v24 = vpop.f32.mrb[27].mxu0  ;;  %v414_v25 = vmax.f32 %v396_v20, 0.0 }
 0x121   : > { %v415_v26 = vmax.f32 %v399_v23, 0.0 }
 0x123   : > { %v422_v28 = vpack.c.bf16 %v415_v26, %v414_v25 }
 0x125   : > { %970 = vmatmul.mubr.msk.bf16.gmra.mrb[24].mxu1 %vm454_vm2, %v422_v28 }
 0x1c8   : > { %v510_v30 = vpop.f32.mrb[0].mxu1 }
 0x1c9   : > { %v511_v31 = vadd.f32 %v864_v29, %v510_v30  ;;  %v947_v32 = vpop.f32.mrb[1].mxu1 }
 0x1ca   : > { %v513_v33 = vpop.f32.mrb[2].mxu1 }
 0x1cb   : > { %566 = vst.msk [vmem:[%s1332_s30] sm:$0xff] %vm565_vm3, %v511_v31  ;;  %v514_v1 = vadd.f32 %v864_v29, %v513_v33  ;;  %v948_v27 = vpop.f32.mrb[3].mxu1 }
 0x1cd   : > { %567 = vst.msk [vmem:[%s1332_s30 + $0x8] sm:$0xff] %vm565_vm3, %v514_v1 }
 0x1d0   : > { %v518_v34 = vpop.f32.mrb[4].mxu1 }
 0x1d1   : > { %v519_v35 = vadd.f32 %v864_v29, %v518_v34  ;;  %v951_v36 = vpop.f32.mrb[5].mxu1 }
 0x1d2   : > { %v521_v37 = vpop.f32.mrb[6].mxu1 }
 0x1d3   : > { %568 = vst.msk [vmem:[%s1332_s30 + $0x10] sm:$0xff] %vm565_vm3, %v519_v35  ;;  %v522_v38 = vadd.f32 %v864_v29, %v521_v37  ;;  %v952_v39 = vpop.f32.mrb[7].mxu1 }
 0x1d5   : > { %569 = vst.msk [vmem:[%s1332_s30 + $0x18] sm:$0xff] %vm565_vm3, %v522_v38 }
 0x1d8   : > { %v526_v40 = vpop.f32.mrb[8].mxu1 }
 0x1d9   : > { %v527_v41 = vadd.f32 %v864_v29, %v526_v40  ;;  %v955_v42 = vpop.f32.mrb[9].mxu1 }
 0x1da   : > { %v529_v43 = vpop.f32.mrb[10].mxu1 }
 0x1db   : > { %570 = vst.msk [vmem:[%s1332_s30 + $0x20] sm:$0xff] %vm565_vm3, %v527_v41  ;;  %v530_v44 = vadd.f32 %v864_v29, %v529_v43  ;;  %v956_v45 = vpop.f32.mrb[11].mxu1 }
 0x1dd   : > { %571 = vst.msk [vmem:[%s1332_s30 + $0x28] sm:$0xff] %vm565_vm3, %v530_v44 }
 0x1e0   : > { %v534_v46 = vpop.f32.mrb[12].mxu1 }
 0x1e1   : > { %v535_v47 = vadd.f32 %v864_v29, %v534_v46  ;;  %v959_v48 = vpop.f32.mrb[13].mxu1 }
 0x1e2   : > { %v537_v49 = vpop.f32.mrb[14].mxu1 }
 0x1e3   : > { %572 = vst.msk [vmem:[%s1332_s30 + $0x30] sm:$0xff] %vm565_vm3, %v535_v47  ;;  %v538_v50 = vadd.f32 %v864_v29, %v537_v49  ;;  %v960_v51 = vpop.f32.mrb[15].mxu1 }
 0x1e5   : > { %573 = vst.msk [vmem:[%s1332_s30 + $0x38] sm:$0xff] %vm565_vm3, %v538_v50 }
 0x1e8   : > { %v542_v52 = vpop.f32.mrb[16].mxu1 }
 0x1e9   : > { %v543_v53 = vadd.f32 %v864_v29, %v542_v52  ;;  %v963_v54 = vpop.f32.mrb[17].mxu1 }
 0x1ea   : > { %v545_v55 = vpop.f32.mrb[18].mxu1 }
 0x1eb   : > { %574 = vst.msk [vmem:[%s1332_s30 + $0x40] sm:$0xff] %vm565_vm3, %v543_v53  ;;  %v546_v56 = vadd.f32 %v864_v29, %v545_v55  ;;  %v964_v57 = vpop.f32.mrb[19].mxu1 }
 0x1ed   : > { %575 = vst.msk [vmem:[%s1332_s30 + $0x48] sm:$0xff] %vm565_vm3, %v546_v56 }
 0x1f0   : > { %v550_v58 = vpop.f32.mrb[20].mxu1 }
 0x1f1   : > { %v551_v59 = vadd.f32 %v864_v29, %v550_v58  ;;  %v967_v60 = vpop.f32.mrb[21].mxu1 }
 0x1f2   : > { %v553_v61 = vpop.f32.mrb[22].mxu1 }
 0x1f3   : > { %576 = vst.msk [vmem:[%s1332_s30 + $0x50] sm:$0xff] %vm565_vm3, %v551_v59  ;;  %v554_v62 = vadd.f32 %v864_v29, %v553_v61  ;;  %v968_v63 = vpop.f32.mrb[23].mxu1 }
 0x1f5   : > { %577 = vst.msk [vmem:[%s1332_s30 + $0x58] sm:$0xff] %vm565_vm3, %v554_v62 }
 0x1f7   : > { %586 = sbr.rel (!%p1219_p4) target bundleno = 571 (0x23b), region = 44 }
 0x1f8   : > { %v558_v0 = vpop.f32.mrb[24].mxu1 }
 0x1f9   : > { %v559_v2 = vadd.f32 %v864_v29, %v558_v0  ;;  %v971_v3 = vpop.f32.mrb[25].mxu1 }
 0x1fa   : > { %v561_v4 = vpop.f32.mrb[26].mxu1 }
 0x1fb   : > { %578 = vst.msk [vmem:[%s1332_s30 + $0x60] sm:$0xff] %vm565_vm3, %v559_v2  ;;  %v562_v5 = vadd.f32 %v864_v29, %v561_v4  ;;  %v972_v6 = vpop.f32.mrb[27].mxu1 }
 0x1fd   : > { %579 = vst.msk [vmem:[%s1332_s30 + $0x68] sm:$0xff] %vm565_vm3, %v562_v5 }
 0x1fe   : > { %s1467_s18 = smov (!%p589_p8, %s588_s18), 14 }
 0x1ff   : > { %s875_s11 = sshll.u32 %s1467_s18, 7 }
 0x200   : > { %p878_p9 = scmp.eq.s32.totalorder %s875_s11, 0 }
 0x201   : > { %1070 = sdivrem.u32 (!%p878_p9), %s1467_s18, 14 }
 0x202   : > { %597 = sbr.rel (%p878_p9) target bundleno = 571 (0x23b), region = 48 }
 0x20a   : > { %s1375_s26 = spop.drf %1070 }
 0x20b   : > { %p879_p10 = scmp.le.s32.totalorder %s1375_s26, 0 }
 0x20c   : > { %s1460_s21 = smov (!%p879_p10), %s1369_s10  ;;  %s1461_s6 = smov (!%p879_p10), %s1332_s30 }
 0x20d   : > { %805 = sbr.rel (%p879_p10) target bundleno = 542 (0x21e), region = 124  ;;  %s1384_s12 = smov (!%p879_p10), 0  }
 0x20e   : > { %s1386_s13 = smov (!%p879_p10), 0  }
 0x214 LB: >> { %v687_v7 = vld [vmem:[%s1136_s6] sm:$0xff]  ;;  %v689_v8 = vld [vmem:[%s1136_s6 + $0x8] sm:$0xff]  ;;  %v691_v9 = vld [vmem:[%s1136_s6 + $0x10] sm:$0xff]  ;;  %s715_s14 = sadd.s32 1, %s1140_s12  ;;  %s681_s13 = sadd.s32 1, %s1144_s13   ;;  %s1144_s13 = sphi %s1386_s13, %s681_s13   ;;  %s1140_s12 = sphi %s1384_s12, %s1462_s12   ;;  %s1136_s6 = sphi %s1461_s6, %s720_s6   ;;  %s1132_s21 = sphi %s1460_s21, %s721_s21  }
 0x215   : >> { %688 = vst [vmem:[%s1132_s21] sm:$0xff] %v687_v7  ;;  %690 = vst [vmem:[%s1132_s21 + $0x8] sm:$0xff] %v689_v8  ;;  %v693_v10 = vld [vmem:[%s1136_s6 + $0x18] sm:$0xff]  ;;  %v695_v11 = vld [vmem:[%s1136_s6 + $0x20] sm:$0xff]  ;;  %p716_p11 = scmp.ge.s32.totalorder %s715_s14, %s1375_s26  ;;  %p680_p12 = scmp.ge.s32.totalorder %s681_s13, %s1375_s26 }
 0x216   : >> { %692 = vst [vmem:[%s1132_s21 + $0x10] sm:$0xff] %v691_v9  ;;  %v697_v12 = vld [vmem:[%s1136_s6 + $0x28] sm:$0xff]  ;;  %694 = vst [vmem:[%s1132_s21 + $0x18] sm:$0xff] %v693_v10  ;;  %v699_v13 = vld [vmem:[%s1136_s6 + $0x30] sm:$0xff] }
 0x217   : >> { %696 = vst [vmem:[%s1132_s21 + $0x20] sm:$0xff] %v695_v11  ;;  %698 = vst [vmem:[%s1132_s21 + $0x28] sm:$0xff] %v697_v12  ;;  %v701_v14 = vld [vmem:[%s1136_s6 + $0x38] sm:$0xff]  ;;  %v703_v15 = vld [vmem:[%s1136_s6 + $0x40] sm:$0xff]  ;;  %s1469_s14 = smov (%p716_p11, %s715_s14), 0  ;;  %683 = sbr.rel (!%p680_p12) target bundleno = 532 (0x214), region = 130 }
 0x218   : >> { %700 = vst [vmem:[%s1132_s21 + $0x30] sm:$0xff] %v699_v13  ;;  %702 = vst [vmem:[%s1132_s21 + $0x38] sm:$0xff] %v701_v14  ;;  %v705_v16 = vld [vmem:[%s1136_s6 + $0x48] sm:$0xff]  ;;  %v707_v17 = vld [vmem:[%s1136_s6 + $0x50] sm:$0xff]  ;;  %s718_s15 = smul.u32 112, %s1469_s14  ;;  %s1462_s12 = smov %s1469_s14 }
 0x219   : >> { %704 = vst [vmem:[%s1132_s21 + $0x40] sm:$0xff] %v703_v15  ;;  %v709_v18 = vld [vmem:[%s1136_s6 + $0x58] sm:$0xff]  ;;  %706 = vst [vmem:[%s1132_s21 + $0x48] sm:$0xff] %v705_v16  ;;  %v711_v19 = vld [vmem:[%s1136_s6 + $0x60] sm:$0xff] }
 0x21a   : >> { %708 = vst [vmem:[%s1132_s21 + $0x50] sm:$0xff] %v707_v17  ;;  %710 = vst [vmem:[%s1132_s21 + $0x58] sm:$0xff] %v709_v18  ;;  %v713_v20 = vld [vmem:[%s1136_s6 + $0x68] sm:$0xff]  ;;  %s720_s6 = scalar_lea.vmem %s1332_s30, %s718_s15 [#allocation2]  }
 0x21b   : >> { %712 = vst [vmem:[%s1132_s21 + $0x60] sm:$0xff] %v711_v19  ;;  %714 = vst [vmem:[%s1132_s21 + $0x68] sm:$0xff] %v713_v20  ;;  %s721_s21 = scalar_lea.vmem %s1369_s10, %s718_s15  }
 0x21e PF: > { %1072 = sdivrem.u32 %s1467_s18, 14 }
 0x21f   : > { %s880_s16 = smul.u32 112, %s1375_s26 }
 0x221   : > { %s726_s17 = scalar_lea.vmem %s1332_s30, %s880_s16 [#allocation2]   ;;  %s728_s20 = scalar_lea.vmem %s1369_s10, %s880_s16  }
 0x227   : > { %s1073_s23 = spop.drf %1072 }
 0x228   : > { %p882_p13 = scmp.le.s32.totalorder %s1073_s23, 0 }
 0x229   : > { %s1146_s24 = smov (!%p882_p13), %s728_s20   ;;  %s1150_s27 = smov (!%p882_p13), %s726_s17  }
 0x22a   : > { %819 = sbr.rel (%p882_p13) target bundleno = 571 (0x23b), region = 135  ;;  %s1154_s28 = smov (!%p882_p13), 0  }
 0x22b   : > { %s1158_s29 = smov (!%p882_p13), 0  }
 0x231 LB: >> { %v738_v21 = vld [vmem:[%s1152_s27] sm:$0xff]  ;;  %s740_s7 = sadd.s32 1, %s1156_s28  ;;  %s732_s29 = sadd.s32 1, %s1160_s29   ;;  %s1160_s29 = sphi %s1158_s29, %s732_s29   ;;  %s1156_s28 = sphi %s1154_s28, %s1155_s28   ;;  %s1152_s27 = sphi %s1150_s27, %s745_s27   ;;  %s1148_s24 = sphi %s1146_s24, %s746_s24  }
 0x232   : >> { %739 = vst [vmem:[%s1148_s24] sm:$0xff] %v738_v21  ;;  %p741_p0 = scmp.ge.s32.totalorder %s740_s7, %s1073_s23  ;;  %p731_p1 = scmp.ge.s32.totalorder %s732_s29, %s1073_s23 }
 0x234   : >> { %s1471_s7 = smov (%p741_p0, %s740_s7), 0  ;;  %734 = sbr.rel (!%p731_p1) target bundleno = 561 (0x231), region = 141 }
 0x235   : >> { %s883_s30 = sshll.u32 %s1471_s7, 3  ;;  %s1155_s28 = smov %s1471_s7  }
 0x236   : >> { %s745_s27 = scalar_lea.vmem %s726_s17, %s883_s30 [#allocation2]   ;;  %s746_s24 = scalar_lea.vmem %s728_s20, %s883_s30  }
 0x23b PF: > { %p12_p2 = scmp.ge.s32.totalorder %s1209_s22, 4   ;;  %s1463_s18 = smov %s1124_s19 }
 0x23c   : > { %s1464_s19 = smov %s1217_s25  ;;  %s1465_s20 = smov %s1209_s22 }
 0x23d   :  { %14 = sbr.rel (!%p12_p2) target bundleno = 2 (0x2), region = 152 }

// kernel: tpu_custom_call.1
= control target key start
LH: loop header
LB: loop body
LE: loop exit
PB: predicated region body
PF: predicated region fallthrough
CT: control target
= control target key end

     0   :  { %s1194_s18 = smov 0   ;;  %s1196_s19 = smov 0   ;;  %s1453_s0 = inlined_call_operand.vmem [shape: f32[200,32], index: 0, kind: input, shape index: {}]   ;;  %s1454_s1 = inlined_call_operand.vmem [shape: bf16[32,48], index: 1, kind: input, shape index: {}]   ;;  %s1455_s2 = inlined_call_operand.vmem [shape: f32[1,48], index: 2, kind: input, shape index: {}]   ;;  %s1456_s3 = inlined_call_operand.vmem [shape: bf16[48,4], index: 3, kind: input, shape index: {}]   ;;  %s1457_s4 = inlined_call_operand.vmem [shape: f32[1,4], index: 4, kind: input, shape index: {}]   ;;  %s1458_s5 = inlined_call_operand.vmem [shape: f32[200,4], index: 5, kind: output, shape index: {}]  }
   0x1   :  { %s1198_s20 = smov 0  }
   0x2 LB: > { %s1207_s21 = sadd.s32 4294967295, %s1128_s20   ;;  %s1209_s22 = sadd.s32 1, %s1128_s20   ;;  %s1128_s20 = sphi %s1198_s20, %s1465_s20   ;;  %s1124_s19 = sphi %s1196_s19, %s1464_s19   ;;  %s1120_s18 = sphi %s1194_s18, %s1463_s18  }
   0x3   : > { %s129_s23 = ssub.s32 %s1128_s20, %s1209_s22  ;;  %s132_s24 = sadd.s32 1, %s1124_s19 }
   0x4   : > { %p130_p0 = scmp.eq.s32.totalorder %s129_s23, 0  ;;  %p142_p1 = scmp.ne.s32.totalorder %s1124_s19, %s1120_s18 }
   0x5   : > { %p143_p2 = scmp.eq.s32.totalorder %s1207_s21, 1  ;;  %p852_p3 = scmp.ge.s32.totalorder %s1128_s20, 1 }
   0x6   : > { %s1217_s25 = scalar_select %p130_p0, %s1124_s19, %s132_s24  }
   0x7   : > { %p1219_p4 = por %p143_p2, %p142_p1  ;;  %p196_p5 = scmp.lt.s32.totalorder %s1128_s20, 3 }
   0x9   : > { %p197_p6 = pnand %p852_p3, %p196_p5 }
   0xa   : > { %v1065_v0 = vld [vmem:[%s1454_s1] sm:$0xff] (!%p197_p6)   ;;  %v1162_v1 = vmov (!%p197_p6), 0.0   ;;  %v1066_v2 = vld [vmem:[%s1454_s1 + $0x8] sm:$0xff] (!%p197_p6)   ;;  %vm1163_vm0 = vmmov (!%p197_p6), 0   ;;  %s1234_s6 = smul.u32 (!%p197_p6), 14, %s1207_s21  ;;  %vm291_vm1 = vcmask (!%p197_p6), 261120  }
   0xb   : > { %200 = sbr.rel (%p197_p6) target bundleno = 571 (0x23b), region = 40  ;;  %907 = vmatprep.subr.bf16.mxu0 (!%p197_p6), %v1162_v1  ;;  %939 = vmatprep.subr.bf16.mxu1 (!%p197_p6), %v1162_v1  ;;  %v1067_v3 = vld [vmem:[%s1456_s3] sm:$0xff] (!%p197_p6)   ;;  %v1068_v25 = vld [vmem:[%s1456_s3 + $0x8] sm:$0xff] (!%p197_p6)   ;;  %v1069_v26 = vld [vmem:[%s1456_s3 + $0x10] sm:$0xff] (!%p197_p6)   ;;  %vm454_vm2 = vcmask (!%p197_p6), 392192   ;;  %s224_s24 = sand.u32 (!%p197_p6), 1, %s1120_s18  }
   0xc   : > { %908 = vmatpush3.bf16.msra.mxu0 (!%p197_p6), %v1065_v0  ;;  %911 = vmatprep.mubr.msk.bf16.mxu0 (!%p197_p6), %vm1163_vm0, %v1162_v1  ;;  %p232_p7 = scmp.lt.s32.totalorder (!%p197_p6), %s1234_s6, 24  ;;  %v1293_v27 = vld [vmem:[%s1455_s2] ss:$0 sm:$0xff] (!%p197_p6)  ;;  %s973_s27 = smul.u32 (!%p197_p6), 112, %s224_s24  ;;  %vm565_vm3 = vcmask (!%p197_p6), 31744  }
   0xd   : > { %909 = vmatprep.subr.bf16.mxu0 (!%p197_p6), %v1162_v1  ;;  %945 = vmatprep.mubr.msk.bf16.mxu1 (!%p197_p6), %vm1163_vm0, %v1162_v1 }
   0xe   : > { %940 = vmatpush3.bf16.msra.mxu1 (!%p197_p6), %v1067_v3  ;;  %s1332_s30 = scalar_lea.vmem (!%p197_p6), [#allocation2], %s973_s27  }
   0xf   : > { %941 = vmatprep.subr.bf16.mxu1 (!%p197_p6), %v1162_v1 }
  0x10   : > { %910 = vmatpush3.bf16.msra.mxu0 (!%p197_p6), %v1066_v2 }
  0x12   : > { %s233_s9 = scalar_select %p232_p7, %s1234_s6, 24  ;;  %942 = vmatpush3.bf16.msra.mxu1 %v1068_v25 }
  0x13   : > { %943 = vmatprep.subr.bf16.mxu1 %v1162_v1  ;;  %s588_s18 = ssub.s32 (%p1219_p4), 25, %s1234_s6  ;;  %s887_s7 = smul.u32 (%p1219_p4), 112, %s1207_s21 }
  0x14   : > { %s853_s10 = sshll.u32 %s233_s9, 3  ;;  %p589_p8 = scmp.lt.s32.totalorder (%p1219_p4), %s588_s18, 14 }
  0x15   : > { %s1248_s13 = scalar_lea.vmem %s1453_s0, %s853_s10  ;;  %s1369_s10 = scalar_lea.vmem (%p1219_p4), %s1458_s5, %s887_s7  }
  0x16   : > { %v247_v4 = vld [vmem:[%s1248_s13] sm:$0xff]  ;;  %v248_v5 = vld [vmem:[%s1248_s13 + $0x8] sm:$0xff]  ;;  %v249_v7 = vld [vmem:[%s1248_s13 + $0x10] sm:$0xff]  ;;  %944 = vmatpush3.bf16.msra.mxu1 %v1069_v26 }
  0x17   : > { %v261_v6 = vpack.c.bf16 %v248_v5, %v247_v4  ;;  %v250_v8 = vld [vmem:[%s1248_s13 + $0x18] sm:$0xff]  ;;  %v251_v10 = vld [vmem:[%s1248_s13 + $0x20] sm:$0xff]  ;;  %v252_v11 = vld [vmem:[%s1248_s13 + $0x28] sm:$0xff] }
  0x18   : > { %v262_v9 = vpack.c.bf16 %v250_v8, %v249_v7  ;;  %v263_v12 = vpack.c.bf16 %v252_v11, %v251_v10  ;;  %v253_v13 = vld [vmem:[%s1248_s13 + $0x30] sm:$0xff]  ;;  %v254_v14 = vld [vmem:[%s1248_s13 + $0x38] sm:$0xff]  ;;  %v255_v16 = vld [vmem:[%s1248_s13 + $0x40] sm:$0xff] }
  0x19   : > { %912 = vmatmul.mubr.msk.bf16.vlgmr.msra.gmra.mrb[0].mxu0 %vm291_vm1, %v261_v6  ;;  %v264_v15 = vpack.c.bf16 %v254_v14, %v253_v13  ;;  %v256_v17 = vld [vmem:[%s1248_s13 + $0x48] sm:$0xff]  ;;  %v257_v19 = vld [vmem:[%s1248_s13 + $0x50] sm:$0xff]  ;;  %v258_v20 = vld [vmem:[%s1248_s13 + $0x58] sm:$0xff] }
  0x1a   : > { %915 = vmatprep.mubr.msk.bf16.mxu0 %vm1163_vm0, %v1162_v1  ;;  %v265_v18 = vpack.c.bf16 %v256_v17, %v255_v16  ;;  %v266_v21 = vpack.c.bf16 %v258_v20, %v257_v19  ;;  %v259_v22 = vld [vmem:[%s1248_s13 + $0x60] sm:$0xff]  ;;  %v260_v23 = vld [vmem:[%s1248_s13 + $0x68] sm:$0xff] }
  0x1b   : > { %v267_v24 = vpack.c.bf16 %v260_v23, %v259_v22 }
  0x21   : > { %916 = vmatmul.mubr.msk.bf16.gmra.mrb[4].mxu0 %vm291_vm1, %v262_v9 }
  0x22   : > { %919 = vmatprep.mubr.msk.bf16.mxu0 %vm1163_vm0, %v1162_v1 }
  0x29   : > { %920 = vmatmul.mubr.msk.bf16.gmra.mrb[8].mxu0 %vm291_vm1, %v263_v12 }
  0x2a   : > { %923 = vmatprep.mubr.msk.bf16.mxu0 %vm1163_vm0, %v1162_v1 }
  0x31   : > { %924 = vmatmul.mubr.msk.bf16.gmra.mrb[12].mxu0 %vm291_vm1, %v264_v15 }
  0x32   : > { %927 = vmatprep.mubr.msk.bf16.mxu0 %vm1163_vm0, %v1162_v1 }
  0x39   : > { %928 = vmatmul.mubr.msk.bf16.gmra.mrb[16].mxu0 %vm291_vm1, %v265_v18 }
  0x3a   : > { %931 = vmatprep.mubr.msk.bf16.mxu0 %vm1163_vm0, %v1162_v1 }
  0x41   : > { %932 = vmatmul.mubr.msk.bf16.gmra.mrb[20].mxu0 %vm291_vm1, %v266_v21 }
  0x42   : > { %935 = vmatprep.mubr.msk.bf16.mxu0 %vm1163_vm0, %v1162_v1 }
  0x49   : > { %936 = vmatmul.mubr.msk.bf16.gmra.mrb[24].mxu0 %vm291_vm1, %v267_v24 }
  0xec   : > { %v347_v28 = vpop.f32.mrb[0].mxu0 }
  0xed   : > { %v348_v29 = vadd.f32 %v1293_v27, %v347_v28  ;;  %v913_v30 = vpop.f32.mrb[1].mxu0 }
  0xee   : > { %v350_v31 = vpop.f32.mrb[2].mxu0 }
  0xef   : > { %v351_v32 = vadd.f32 %v1293_v27, %v350_v31  ;;  %v914_v33 = vpop.f32.mrb[3].mxu0  ;;  %v402_v34 = vmax.f32 %v348_v29, 0.0  ;;  %v864_v29 = vld [vmem:[%s1457_s4] ss:$0 sm:$0xff] }
  0xf1   : > { %v403_v35 = vmax.f32 %v351_v32, 0.0 }
  0xf3   : > { %v416_v36 = vpack.c.bf16 %v403_v35, %v402_v34 }
  0xf4   : > { %v355_v37 = vpop.f32.mrb[4].mxu0 }
  0xf5   : > { %v356_v38 = vadd.f32 %v1293_v27, %v355_v37  ;;  %v917_v39 = vpop.f32.mrb[5].mxu0  ;;  %946 = vmatmul.mubr.msk.bf16.vlgmr.msra.gmra.mrb[0].mxu1 %vm454_vm2, %v416_v36 }
  0xf6   : > { %v358_v40 = vpop.f32.mrb[6].mxu0  ;;  %949 = vmatprep.mubr.msk.bf16.mxu1 %vm1163_vm0, %v1162_v1 }
  0xf7   : > { %v359_v41 = vadd.f32 %v1293_v27, %v358_v40  ;;  %v918_v42 = vpop.f32.mrb[7].mxu0  ;;  %v404_v43 = vmax.f32 %v356_v38, 0.0 }
  0xf9   : > { %v405_v44 = vmax.f32 %v359_v41, 0.0 }
  0xfb   : > { %v417_v45 = vpack.c.bf16 %v405_v44, %v404_v43 }
  0xfc   : > { %v363_v46 = vpop.f32.mrb[8].mxu0 }
  0xfd   : > { %v364_v47 = vadd.f32 %v1293_v27, %v363_v46  ;;  %v921_v48 = vpop.f32.mrb[9].mxu0  ;;  %950 = vmatmul.mubr.msk.bf16.gmra.mrb[4].mxu1 %vm454_vm2, %v417_v45 }
  0xfe   : > { %v366_v49 = vpop.f32.mrb[10].mxu0  ;;  %953 = vmatprep.mubr.msk.bf16.mxu1 %vm1163_vm0, %v1162_v1 }
  0xff   : > { %v367_v50 = vadd.f32 %v1293_v27, %v366_v49  ;;  %v922_v51 = vpop.f32.mrb[11].mxu0  ;;  %v406_v52 = vmax.f32 %v364_v47, 0.0 }
 0x101   : > { %v407_v53 = vmax.f32 %v367_v50, 0.0 }
 0x103   : > { %v418_v54 = vpack.c.bf16 %v407_v53, %v406_v52 }
 0x104   : > { %v371_v55 = vpop.f32.mrb[12].mxu0 }
 0x105   : > { %v372_v56 = vadd.f32 %v1293_v27, %v371_v55  ;;  %v925_v57 = vpop.f32.mrb[13].mxu0  ;;  %954 = vmatmul.mubr.msk.bf16.gmra.mrb[8].mxu1 %vm454_vm2, %v418_v54 }
 0x106   : > { %v374_v58 = vpop.f32.mrb[14].mxu0  ;;  %957 = vmatprep.mubr.msk.bf16.mxu1 %vm1163_vm0, %v1162_v1 }
 0x107   : > { %v375_v59 = vadd.f32 %v1293_v27, %v374_v58  ;;  %v926_v60 = vpop.f32.mrb[15].mxu0  ;;  %v408_v61 = vmax.f32 %v372_v56, 0.0 }
 0x109   : > { %v409_v62 = vmax.f32 %v375_v59, 0.0 }
 0x10b   : > { %v419_v63 = vpack.c.bf16 %v409_v62, %v408_v61 }
 0x10c   : > { %v379_v0 = vpop.f32.mrb[16].mxu0 }
 0x10d   : > { %v380_v2 = vadd.f32 %v1293_v27, %v379_v0  ;;  %v929_v3 = vpop.f32.mrb[17].mxu0  ;;  %958 = vmatmul.mubr.msk.bf16.gmra.mrb[12].mxu1 %vm454_vm2, %v419_v63 }
 0x10e   : > { %v382_v4 = vpop.f32.mrb[18].mxu0  ;;  %961 = vmatprep.mubr.msk.bf16.mxu1 %vm1163_vm0, %v1162_v1 }
 0x10f   : > { %v383_v5 = vadd.f32 %v1293_v27, %v382_v4  ;;  %v930_v6 = vpop.f32.mrb[19].mxu0  ;;  %v410_v7 = vmax.f32 %v380_v2, 0.0 }
 0x111   : > { %v411_v8 = vmax.f32 %v383_v5, 0.0 }
 0x113   : > { %v420_v9 = vpack.c.bf16 %v411_v8, %v410_v7 }
 0x114   : > { %v387_v10 = vpop.f32.mrb[20].mxu0 }
 0x115   : > { %v388_v11 = vadd.f32 %v1293_v27, %v387_v10  ;;  %v933_v12 = vpop.f32.mrb[21].mxu0  ;;  %962 = vmatmul.mubr.msk.bf16.gmra.mrb[16].mxu1 %vm454_vm2, %v420_v9 }
 0x116   : > { %v390_v13 = vpop.f32.mrb[22].mxu0  ;;  %965 = vmatprep.mubr.msk.bf16.mxu1 %vm1163_vm0, %v1162_v1 }
 0x117   : > { %v391_v14 = vadd.f32 %v1293_v27, %v390_v13  ;;  %v934_v15 = vpop.f32.mrb[23].mxu0  ;;  %v412_v16 = vmax.f32 %v388_v11, 0.0 }
 0x119   : > { %v413_v17 = vmax.f32 %v391_v14, 0.0 }
 0x11b   : > { %v421_v18 = vpack.c.bf16 %v413_v17, %v412_v16 }
 0x11c   : > { %v395_v19 = vpop.f32.mrb[24].mxu0 }
 0x11d   : > { %v396_v20 = vadd.f32 %v1293_v27, %v395_v19  ;;  %v937_v21 = vpop.f32.mrb[25].mxu0  ;;  %966 = vmatmul.mubr.msk.bf16.gmra.mrb[20].mxu1 %vm454_vm2, %v421_v18 }
 0x11e   : > { %v398_v22 = vpop.f32.mrb[26].mxu0  ;;  %969 = vmatprep.mubr.msk.bf16.mxu1 %vm1163_vm0, %v1162_v1 }
 0x11f   : > { %v399_v23 = vadd.f32 %v1293_v27, %v398_v22  ;;  %v938_v24 = vpop.f32.mrb[27].mxu0  ;;  %v414_v25 = vmax.f32 %v396_v20, 0.0 }
 0x121   : > { %v415_v26 = vmax.f32 %v399_v23, 0.0 }
 0x123   : > { %v422_v28 = vpack.c.bf16 %v415_v26, %v414_v25 }
 0x125   : > { %970 = vmatmul.mubr.msk.bf16.gmra.mrb[24].mxu1 %vm454_vm2, %v422_v28 }
 0x1c8   : > { %v510_v30 = vpop.f32.mrb[0].mxu1 }
 0x1c9   : > { %v511_v31 = vadd.f32 %v864_v29, %v510_v30  ;;  %v947_v32 = vpop.f32.mrb[1].mxu1 }
 0x1ca   : > { %v513_v33 = vpop.f32.mrb[2].mxu1 }
 0x1cb   : > { %566 = vst.msk [vmem:[%s1332_s30] sm:$0xff] %vm565_vm3, %v511_v31  ;;  %v514_v1 = vadd.f32 %v864_v29, %v513_v33  ;;  %v948_v27 = vpop.f32.mrb[3].mxu1 }
 0x1cd   : > { %567 = vst.msk [vmem:[%s1332_s30 + $0x8] sm:$0xff] %vm565_vm3, %v514_v1 }
 0x1d0   : > { %v518_v34 = vpop.f32.mrb[4].mxu1 }
 0x1d1   : > { %v519_v35 = vadd.f32 %v864_v29, %v518_v34  ;;  %v951_v36 = vpop.f32.mrb[5].mxu1 }
 0x1d2   : > { %v521_v37 = vpop.f32.mrb[6].mxu1 }
 0x1d3   : > { %568 = vst.msk [vmem:[%s1332_s30 + $0x10] sm:$0xff] %vm565_vm3, %v519_v35  ;;  %v522_v38 = vadd.f32 %v864_v29, %v521_v37  ;;  %v952_v39 = vpop.f32.mrb[7].mxu1 }
 0x1d5   : > { %569 = vst.msk [vmem:[%s1332_s30 + $0x18] sm:$0xff] %vm565_vm3, %v522_v38 }
 0x1d8   : > { %v526_v40 = vpop.f32.mrb[8].mxu1 }
 0x1d9   : > { %v527_v41 = vadd.f32 %v864_v29, %v526_v40  ;;  %v955_v42 = vpop.f32.mrb[9].mxu1 }
 0x1da   : > { %v529_v43 = vpop.f32.mrb[10].mxu1 }
 0x1db   : > { %570 = vst.msk [vmem:[%s1332_s30 + $0x20] sm:$0xff] %vm565_vm3, %v527_v41  ;;  %v530_v44 = vadd.f32 %v864_v29, %v529_v43  ;;  %v956_v45 = vpop.f32.mrb[11].mxu1 }
 0x1dd   : > { %571 = vst.msk [vmem:[%s1332_s30 + $0x28] sm:$0xff] %vm565_vm3, %v530_v44 }
 0x1e0   : > { %v534_v46 = vpop.f32.mrb[12].mxu1 }
 0x1e1   : > { %v535_v47 = vadd.f32 %v864_v29, %v534_v46  ;;  %v959_v48 = vpop.f32.mrb[13].mxu1 }
 0x1e2   : > { %v537_v49 = vpop.f32.mrb[14].mxu1 }
 0x1e3   : > { %572 = vst.msk [vmem:[%s1332_s30 + $0x30] sm:$0xff] %vm565_vm3, %v535_v47  ;;  %v538_v50 = vadd.f32 %v864_v29, %v537_v49  ;;  %v960_v51 = vpop.f32.mrb[15].mxu1 }
 0x1e5   : > { %573 = vst.msk [vmem:[%s1332_s30 + $0x38] sm:$0xff] %vm565_vm3, %v538_v50 }
 0x1e8   : > { %v542_v52 = vpop.f32.mrb[16].mxu1 }
 0x1e9   : > { %v543_v53 = vadd.f32 %v864_v29, %v542_v52  ;;  %v963_v54 = vpop.f32.mrb[17].mxu1 }
 0x1ea   : > { %v545_v55 = vpop.f32.mrb[18].mxu1 }
 0x1eb   : > { %574 = vst.msk [vmem:[%s1332_s30 + $0x40] sm:$0xff] %vm565_vm3, %v543_v53  ;;  %v546_v56 = vadd.f32 %v864_v29, %v545_v55  ;;  %v964_v57 = vpop.f32.mrb[19].mxu1 }
 0x1ed   : > { %575 = vst.msk [vmem:[%s1332_s30 + $0x48] sm:$0xff] %vm565_vm3, %v546_v56 }
 0x1f0   : > { %v550_v58 = vpop.f32.mrb[20].mxu1 }
 0x1f1   : > { %v551_v59 = vadd.f32 %v864_v29, %v550_v58  ;;  %v967_v60 = vpop.f32.mrb[21].mxu1 }
 0x1f2   : > { %v553_v61 = vpop.f32.mrb[22].mxu1 }
 0x1f3   : > { %576 = vst.msk [vmem:[%s1332_s30 + $0x50] sm:$0xff] %vm565_vm3, %v551_v59  ;;  %v554_v62 = vadd.f32 %v864_v29, %v553_v61  ;;  %v968_v63 = vpop.f32.mrb[23].mxu1 }
 0x1f5   : > { %577 = vst.msk [vmem:[%s1332_s30 + $0x58] sm:$0xff] %vm565_vm3, %v554_v62 }
 0x1f7   : > { %586 = sbr.rel (!%p1219_p4) target bundleno = 571 (0x23b), region = 44 }
 0x1f8   : > { %v558_v0 = vpop.f32.mrb[24].mxu1 }
 0x1f9   : > { %v559_v2 = vadd.f32 %v864_v29, %v558_v0  ;;  %v971_v3 = vpop.f32.mrb[25].mxu1 }
 0x1fa   : > { %v561_v4 = vpop.f32.mrb[26].mxu1 }
 0x1fb   : > { %578 = vst.msk [vmem:[%s1332_s30 + $0x60] sm:$0xff] %vm565_vm3, %v559_v2  ;;  %v562_v5 = vadd.f32 %v864_v29, %v561_v4  ;;  %v972_v6 = vpop.f32.mrb[27].mxu1 }
 0x1fd   : > { %579 = vst.msk [vmem:[%s1332_s30 + $0x68] sm:$0xff] %vm565_vm3, %v562_v5 }
 0x1fe   : > { %s1467_s18 = smov (!%p589_p8, %s588_s18), 14 }
 0x1ff   : > { %s875_s11 = sshll.u32 %s1467_s18, 7 }
 0x200   : > { %p878_p9 = scmp.eq.s32.totalorder %s875_s11, 0 }
 0x201   : > { %1070 = sdivrem.u32 (!%p878_p9), %s1467_s18, 14 }
 0x202   : > { %597 = sbr.rel (%p878_p9) target bundleno = 571 (0x23b), region = 48 }
 0x20a   : > { %s1375_s26 = spop.drf %1070 }
 0x20b   : > { %p879_p10 = scmp.le.s32.totalorder %s1375_s26, 0 }
 0x20c   : > { %s1460_s21 = smov (!%p879_p10), %s1369_s10  ;;  %s1461_s6 = smov (!%p879_p10), %s1332_s30 }
 0x20d   : > { %805 = sbr.rel (%p879_p10) target bundleno = 542 (0x21e), region = 124  ;;  %s1384_s12 = smov (!%p879_p10), 0  }
 0x20e   : > { %s1386_s13 = smov (!%p879_p10), 0  }
 0x214 LB: >> { %v687_v7 = vld [vmem:[%s1136_s6] sm:$0xff]  ;;  %v689_v8 = vld [vmem:[%s1136_s6 + $0x8] sm:$0xff]  ;;  %v691_v9 = vld [vmem:[%s1136_s6 + $0x10] sm:$0xff]  ;;  %s715_s14 = sadd.s32 1, %s1140_s12  ;;  %s681_s13 = sadd.s32 1, %s1144_s13   ;;  %s1144_s13 = sphi %s1386_s13, %s681_s13   ;;  %s1140_s12 = sphi %s1384_s12, %s1462_s12   ;;  %s1136_s6 = sphi %s1461_s6, %s720_s6   ;;  %s1132_s21 = sphi %s1460_s21, %s721_s21  }
 0x215   : >> { %688 = vst [vmem:[%s1132_s21] sm:$0xff] %v687_v7  ;;  %690 = vst [vmem:[%s1132_s21 + $0x8] sm:$0xff] %v689_v8  ;;  %v693_v10 = vld [vmem:[%s1136_s6 + $0x18] sm:$0xff]  ;;  %v695_v11 = vld [vmem:[%s1136_s6 + $0x20] sm:$0xff]  ;;  %p716_p11 = scmp.ge.s32.totalorder %s715_s14, %s1375_s26  ;;  %p680_p12 = scmp.ge.s32.totalorder %s681_s13, %s1375_s26 }
 0x216   : >> { %692 = vst [vmem:[%s1132_s21 + $0x10] sm:$0xff] %v691_v9  ;;  %v697_v12 = vld [vmem:[%s1136_s6 + $0x28] sm:$0xff]  ;;  %694 = vst [vmem:[%s1132_s21 + $0x18] sm:$0xff] %v693_v10  ;;  %v699_v13 = vld [vmem:[%s1136_s6 + $0x30] sm:$0xff] }
 0x217   : >> { %696 = vst [vmem:[%s1132_s21 + $0x20] sm:$0xff] %v695_v11  ;;  %698 = vst [vmem:[%s1132_s21 + $0x28] sm:$0xff] %v697_v12  ;;  %v701_v14 = vld [vmem:[%s1136_s6 + $0x38] sm:$0xff]  ;;  %v703_v15 = vld [vmem:[%s1136_s6 + $0x40] sm:$0xff]  ;;  %s1469_s14 = smov (%p716_p11, %s715_s14), 0  ;;  %683 = sbr.rel (!%p680_p12) target bundleno = 532 (0x214), region = 130 }
 0x218   : >> { %700 = vst [vmem:[%s1132_s21 + $0x30] sm:$0xff] %v699_v13  ;;  %702 = vst [vmem:[%s1132_s21 + $0x38] sm:$0xff] %v701_v14  ;;  %v705_v16 = vld [vmem:[%s1136_s6 + $0x48] sm:$0xff]  ;;  %v707_v17 = vld [vmem:[%s1136_s6 + $0x50] sm:$0xff]  ;;  %s718_s15 = smul.u32 112, %s1469_s14  ;;  %s1462_s12 = smov %s1469_s14 }
 0x219   : >> { %704 = vst [vmem:[%s1132_s21 + $0x40] sm:$0xff] %v703_v15  ;;  %v709_v18 = vld [vmem:[%s1136_s6 + $0x58] sm:$0xff]  ;;  %706 = vst [vmem:[%s1132_s21 + $0x48] sm:$0xff] %v705_v16  ;;  %v711_v19 = vld [vmem:[%s1136_s6 + $0x60] sm:$0xff] }
 0x21a   : >> { %708 = vst [vmem:[%s1132_s21 + $0x50] sm:$0xff] %v707_v17  ;;  %710 = vst [vmem:[%s1132_s21 + $0x58] sm:$0xff] %v709_v18  ;;  %v713_v20 = vld [vmem:[%s1136_s6 + $0x68] sm:$0xff]  ;;  %s720_s6 = scalar_lea.vmem %s1332_s30, %s718_s15 [#allocation2]  }
 0x21b   : >> { %712 = vst [vmem:[%s1132_s21 + $0x60] sm:$0xff] %v711_v19  ;;  %714 = vst [vmem:[%s1132_s21 + $0x68] sm:$0xff] %v713_v20  ;;  %s721_s21 = scalar_lea.vmem %s1369_s10, %s718_s15  }
 0x21e PF: > { %1072 = sdivrem.u32 %s1467_s18, 14 }
 0x21f   : > { %s880_s16 = smul.u32 112, %s1375_s26 }
 0x221   : > { %s726_s17 = scalar_lea.vmem %s1332_s30, %s880_s16 [#allocation2]   ;;  %s728_s20 = scalar_lea.vmem %s1369_s10, %s880_s16  }
 0x227   : > { %s1073_s23 = spop.drf %1072 }
 0x228   : > { %p882_p13 = scmp.le.s32.totalorder %s1073_s23, 0 }
 0x229   : > { %s1146_s24 = smov (!%p882_p13), %s728_s20   ;;  %s1150_s27 = smov (!%p882_p13), %s726_s17  }
 0x22a   : > { %819 = sbr.rel (%p882_p13) target bundleno = 571 (0x23b), region = 135  ;;  %s1154_s28 = smov (!%p882_p13), 0  }
 0x22b   : > { %s1158_s29 = smov (!%p882_p13), 0  }
 0x231 LB: >> { %v738_v21 = vld [vmem:[%s1152_s27] sm:$0xff]  ;;  %s740_s7 = sadd.s32 1, %s1156_s28  ;;  %s732_s29 = sadd.s32 1, %s1160_s29   ;;  %s1160_s29 = sphi %s1158_s29, %s732_s29   ;;  %s1156_s28 = sphi %s1154_s28, %s1155_s28   ;;  %s1152_s27 = sphi %s1150_s27, %s745_s27   ;;  %s1148_s24 = sphi %s1146_s24, %s746_s24  }
 0x232   : >> { %739 = vst [vmem:[%s1148_s24] sm:$0xff] %v738_v21  ;;  %p741_p0 = scmp.ge.s32.totalorder %s740_s7, %s1073_s23  ;;  %p731_p1 = scmp.ge.s32.totalorder %s732_s29, %s1073_s23 }
 0x234   : >> { %s1471_s7 = smov (%p741_p0, %s740_s7), 0  ;;  %734 = sbr.rel (!%p731_p1) target bundleno = 561 (0x231), region = 141 }
 0x235   : >> { %s883_s30 = sshll.u32 %s1471_s7, 3  ;;  %s1155_s28 = smov %s1471_s7  }
 0x236   : >> { %s745_s27 = scalar_lea.vmem %s726_s17, %s883_s30 [#allocation2]   ;;  %s746_s24 = scalar_lea.vmem %s728_s20, %s883_s30  }
 0x23b PF: > { %p12_p2 = scmp.ge.s32.totalorder %s1209_s22, 4   ;;  %s1463_s18 = smov %s1124_s19 }
 0x23c   : > { %s1464_s19 = smov %s1217_s25  ;;  %s1465_s20 = smov %s1209_s22 }
 0x23d   :  { %14 = sbr.rel (!%p12_p2) target bundleno = 2 (0x2), region = 152 }

</bundles_post_ra>
